<compile_context>
chip_gen: v6e
topology: v6e:2x2x1
jax: 0.10.0
libtpu: 0.0.40
codegen_flags: <defaults>
</compile_context>

<pallas_src>
import jax
import jax.numpy as jnp
from jax import lax
from jax.experimental import pallas as pl
from jax.experimental.pallas import tpu as pltpu

LN_EPS = 1e-5


def _embed_ln_kernel(ids_ref, tok_ref, pos_ref, gamma_ref, beta_ref, out_ref):
    # ids_ref   : (1, TS, 1) int32   -- token ids for this block (sublane axis = tokens)
    # tok_ref   : (V, D)     bf16    -- full token table, VMEM resident (same block every step)
    # pos_ref   : (TS, D)    bf16    -- positional rows for this sequence block
    # gamma_ref : (1, D)     f32
    # beta_ref  : (1, D)     f32
    # out_ref   : (1, TS, D) f32
    ids = ids_ref[0]                                   # (TS, 1) int32
    ts = ids.shape[0]
    v = tok_ref.shape[0]

    # One-hot gather on the MXU: (TS, V) bf16 @ (V, D) bf16 -> (TS, D) f32.
    onehot = (ids == lax.broadcasted_iota(jnp.int32, (ts, v), 1)).astype(tok_ref.dtype)
    tok = jnp.dot(onehot, tok_ref[...], preferred_element_type=jnp.float32)

    e = tok + pos_ref[...].astype(jnp.float32)         # (TS, D) f32

    # LayerNorm (biased variance, eps inside rsqrt) — all in f32.
    mean = jnp.mean(e, axis=-1, keepdims=True)
    var = jnp.mean((e - mean) * (e - mean), axis=-1, keepdims=True)
    inv = lax.rsqrt(var + LN_EPS)
    y = (e - mean) * inv * gamma_ref[...] + beta_ref[...]

    out_ref[0] = y.astype(out_ref.dtype)


def _round_up(x, m):
    return (x + m - 1) // m * m


def embedding_forward(x_ids, tok_table, pos_table, gamma, beta,
                      *, block_tokens=256, table_dtype=jnp.bfloat16):
    """x_ids: (B, S) int; tables f32/bf16; returns (B, S, D) float32."""
    B, S = x_ids.shape
    V, D = tok_table.shape
    maxlen = pos_table.shape[0]

    # Tokens per grid step along the sequence axis: multiple of 8, <= block_tokens.
    TS = min(block_tokens, _round_up(S, 8))
    S_pad = _round_up(S, TS)

    # Clamp ids (defensive vs. padding / OOB ids) and pad the sequence axis.
    ids = jnp.clip(x_ids.astype(jnp.int32), 0, V - 1)
    if S_pad != S:
        ids = jnp.pad(ids, ((0, 0), (0, S_pad - S)))
    ids3d = ids.reshape(B, S_pad, 1)                   # tokens on the sublane axis

    # bf16 tables halve HBM traffic; LayerNorm math stays in f32 inside the kernel.
    tok_tab = tok_table.astype(table_dtype)
    pos_tab = pos_table.astype(table_dtype)
    P = max(maxlen, S_pad)
    if P != maxlen:                                    # rows only read for padded (trimmed) positions
        pos_tab = jnp.pad(pos_tab, ((0, P - maxlen), (0, 0)))

    gamma2d = gamma.reshape(1, D).astype(jnp.float32)
    beta2d = beta.reshape(1, D).astype(jnp.float32)

    grid = (B, S_pad // TS)

    out = pl.pallas_call(
        _embed_ln_kernel,
        out_shape=jax.ShapeDtypeStruct((B, S_pad, D), jnp.float32),
        grid_spec=pltpu.PrefetchScalarGridSpec(
            num_scalar_prefetch=0,
            grid=grid,
            in_specs=[
                # token ids for this (batch, seq-block)
                pl.BlockSpec((1, TS, 1), lambda b, s: (b, s, 0)),
                # full token table — same block every step => VMEM resident
                pl.BlockSpec((V, D), lambda b, s: (0, 0)),
                # positional rows: contiguous slice s*TS .. s*TS+TS-1
                pl.BlockSpec((TS, D), lambda b, s: (s, 0)),
                # LayerNorm gamma / beta — resident (1, D) blocks
                pl.BlockSpec((1, D), lambda b, s: (0, 0)),
                pl.BlockSpec((1, D), lambda b, s: (0, 0)),
            ],
            out_specs=pl.BlockSpec((1, TS, D), lambda b, s: (b, s, 0)),
        ),
        compiler_params=pltpu.CompilerParams(
            # Both axes independent: lets v7x shard across its 2 TensorCores;
            # neutral on v5e/v6e.
            dimension_semantics=("parallel", "parallel"),
        ),
    )(ids3d, tok_tab, pos_tab, gamma2d, beta2d)

    return out[:, :S, :]


def embedding_forward_ref(x_ids, tok_table, pos_table, gamma, beta):
    """Pure-JAX reference mirroring the PyTorch forward."""
    B, S = x_ids.shape
    pos = jnp.arange(S, dtype=jnp.int32)[None, :].repeat(B, axis=0)
    e = tok_table[x_ids].astype(jnp.float32) + pos_table[pos].astype(jnp.float32)
    mean = jnp.mean(e, axis=-1, keepdims=True)
    var = jnp.mean((e - mean) ** 2, axis=-1, keepdims=True)
    return (e - mean) * lax.rsqrt(var + LN_EPS) * gamma + beta


if __name__ == "__main__":
    # Small, deterministic setup consistent with Embedding(d_model, vocab_size, maxlen, device)
    d_model = 128          # lane-aligned hidden size
    vocab_size = 32
    maxlen = 16
    batch, seq = 2, 8      # seq <= maxlen

    key = jax.random.PRNGKey(0)
    k_tok, k_pos, k_ids = jax.random.split(key, 3)

    # nn.Embedding default init: N(0, 1); nn.LayerNorm: weight=1, bias=0
    tok_table = jax.random.normal(k_tok, (vocab_size, d_model), dtype=jnp.float32)
    pos_table = jax.random.normal(k_pos, (maxlen, d_model), dtype=jnp.float32)
    gamma = jnp.ones((d_model,), dtype=jnp.float32)
    beta = jnp.zeros((d_model,), dtype=jnp.float32)

    x_ids = jax.random.randint(k_ids, (batch, seq), 0, vocab_size, dtype=jnp.int32)

    out = jax.block_until_ready(embedding_forward(x_ids, tok_table, pos_table, gamma, beta))

    # Reference uses the same bf16-rounded tables the kernel reads, so the only
    # remaining difference is f32 arithmetic order — compare tightly.
    tok_bf = tok_table.astype(jnp.bfloat16).astype(jnp.float32)
    pos_bf = pos_table.astype(jnp.bfloat16).astype(jnp.float32)
    ref = embedding_forward_ref(x_ids, tok_bf, pos_bf, gamma, beta)

    assert out.shape == (batch, seq, d_model)
    assert jnp.allclose(out, ref, atol=1e-3, rtol=1e-3), float(jnp.max(jnp.abs(out - ref)))

    print("KERNEL_OK")
</pallas_src>

<mosaic_0001>
module attributes {stable_mosaic.version = 11 : i64} {
  func.func @_embed_ln_kernel(%arg0: i32, %arg1: i32, %arg2: memref<1x8x1xi32, #tpu.memory_space<vmem>>, %arg3: memref<32x128xbf16, #tpu.memory_space<vmem>>, %arg4: memref<8x128xbf16, #tpu.memory_space<vmem>>, %arg5: memref<1x128xf32, #tpu.memory_space<vmem>>, %arg6: memref<1x128xf32, #tpu.memory_space<vmem>>, %arg7: memref<1x8x128xf32, #tpu.memory_space<vmem>>) attributes {dimension_semantics = [#tpu.dimension_semantics<parallel>, #tpu.dimension_semantics<parallel>], iteration_bounds = array<i64: 2, 1>, scalar_prefetch = 0 : i64, scratch_operands = 0 : i64, tpu.core_type = #tpu.core_type<tc>, window_params = [{transform_indices = @transform_0, window_bounds = array<i64: 1, 8, 1>}, {pipeline_mode = #tpu.pipeline_mode<synchronous>, transform_indices = @transform_1, window_bounds = array<i64: 32, 128>}, {transform_indices = @transform_2, window_bounds = array<i64: 8, 128>}, {pipeline_mode = #tpu.pipeline_mode<synchronous>, transform_indices = @transform_3, window_bounds = array<i64: 1, 128>}, {pipeline_mode = #tpu.pipeline_mode<synchronous>, transform_indices = @transform_4, window_bounds = array<i64: 1, 128>}, {transform_indices = @transform_5, window_bounds = array<i64: 1, 8, 128>}]} {
    %c0 = arith.constant 0 : index
    %c0_0 = arith.constant 0 : index
    %c0_1 = arith.constant 0 : index
    %0 = vector.load %arg2[%c0, %c0_0, %c0_1] : memref<1x8x1xi32, #tpu.memory_space<vmem>>, vector<1x8x1xi32>
    %1 = vector.shape_cast %0 : vector<1x8x1xi32> to vector<8x1xi32>
    %2 = tpu.iota {dimensions = array<i32: 1>} : vector<8x32xi32>
    %3 = vector.broadcast %1 : vector<8x1xi32> to vector<8x32xi32>
    %4 = arith.cmpi eq, %3, %2 : vector<8x32xi32>
    %5 = arith.extui %4 : vector<8x32xi1> to vector<8x32xi32>
    %6 = arith.sitofp %5 : vector<8x32xi32> to vector<8x32xf32>
    %7 = arith.truncf %6 : vector<8x32xf32> to vector<8x32xbf16>
    %c0_2 = arith.constant 0 : index
    %c0_3 = arith.constant 0 : index
    %8 = vector.load %arg3[%c0_2, %c0_3] : memref<32x128xbf16, #tpu.memory_space<vmem>>, vector<32x128xbf16>
    %cst = arith.constant dense<0.000000e+00> : vector<8x128xf32>
    %9 = tpu.matmul %7, %8, %cst {dimension_numbers = #tpu.dot_dimension_numbers<[1], [0], [0], [1], [0, 0, 1, 1], [], []>} : vector<8x32xbf16>, vector<32x128xbf16>, vector<8x128xf32> -> vector<8x128xf32>
    %c0_4 = arith.constant 0 : index
    %c0_5 = arith.constant 0 : index
    %10 = vector.load %arg4[%c0_4, %c0_5] : memref<8x128xbf16, #tpu.memory_space<vmem>>, vector<8x128xbf16>
    %11 = arith.extf %10 : vector<8x128xbf16> to vector<8x128xf32>
    %12 = arith.addf %9, %11 : vector<8x128xf32>
    %cst_6 = arith.constant dense<0.000000e+00> : vector<8xf32>
    %13 = vector.multi_reduction <add>, %12, %cst_6 [1] : vector<8x128xf32> to vector<8xf32>
    %14 = vector.shape_cast %13 : vector<8xf32> to vector<8x1xf32>
    %cst_7 = arith.constant 1.280000e+02 : f32
    %15 = vector.broadcast %cst_7 : f32 to vector<8x1xf32>
    %16 = arith.divf %14, %15 : vector<8x1xf32>
    %17 = vector.broadcast %16 : vector<8x1xf32> to vector<8x128xf32>
    %18 = arith.subf %12, %17 : vector<8x128xf32>
    %19 = vector.broadcast %16 : vector<8x1xf32> to vector<8x128xf32>
    %20 = arith.subf %12, %19 : vector<8x128xf32>
    %21 = arith.mulf %18, %20 : vector<8x128xf32>
    %cst_8 = arith.constant dense<0.000000e+00> : vector<8xf32>
    %22 = vector.multi_reduction <add>, %21, %cst_8 [1] : vector<8x128xf32> to vector<8xf32>
    %23 = vector.shape_cast %22 : vector<8xf32> to vector<8x1xf32>
    %cst_9 = arith.constant 1.280000e+02 : f32
    %24 = vector.broadcast %cst_9 : f32 to vector<8x1xf32>
    %25 = arith.divf %23, %24 : vector<8x1xf32>
    %cst_10 = arith.constant 9.99999974E-6 : f32
    %26 = vector.broadcast %cst_10 : f32 to vector<8x1xf32>
    %27 = arith.addf %25, %26 : vector<8x1xf32>
    %28 = math.rsqrt %27 : vector<8x1xf32>
    %29 = vector.broadcast %16 : vector<8x1xf32> to vector<8x128xf32>
    %30 = arith.subf %12, %29 : vector<8x128xf32>
    %31 = vector.broadcast %28 : vector<8x1xf32> to vector<8x128xf32>
    %32 = arith.mulf %30, %31 : vector<8x128xf32>
    %c0_11 = arith.constant 0 : index
    %c0_12 = arith.constant 0 : index
    %33 = vector.load %arg5[%c0_11, %c0_12] : memref<1x128xf32, #tpu.memory_space<vmem>>, vector<1x128xf32>
    %34 = vector.broadcast %33 : vector<1x128xf32> to vector<8x128xf32>
    %35 = arith.mulf %32, %34 : vector<8x128xf32>
    %c0_13 = arith.constant 0 : index
    %c0_14 = arith.constant 0 : index
    %36 = vector.load %arg6[%c0_13, %c0_14] : memref<1x128xf32, #tpu.memory_space<vmem>>, vector<1x128xf32>
    %37 = vector.broadcast %36 : vector<1x128xf32> to vector<8x128xf32>
    %38 = arith.addf %35, %37 : vector<8x128xf32>
    %c0_15 = arith.constant 0 : index
    %c0_16 = arith.constant 0 : index
    %c0_17 = arith.constant 0 : index
    %39 = vector.load %arg7[%c0_15, %c0_16, %c0_17] : memref<1x8x128xf32, #tpu.memory_space<vmem>>, vector<1x8x128xf32>
    %40 = vector.shape_cast %39 : vector<1x8x128xf32> to vector<8x128xf32>
    %41 = vector.shape_cast %38 : vector<8x128xf32> to vector<1x8x128xf32>
    tpu.vector_store %arg7[%c0_15, %c0_16, %c0_17], %41 {strides = array<i32>} : memref<1x8x128xf32, #tpu.memory_space<vmem>>, vector<1x8x128xf32>,
    return
  }
  func.func @transform_0(%arg0: i32, %arg1: i32) -> (i32, i32, i32) {
    %c0_i32 = arith.constant 0 : i32
    %c0_i32_0 = arith.constant 0 : i32
    return %arg0, %arg1, %c0_i32 : i32, i32, i32
  }
  func.func @transform_1(%arg0: i32, %arg1: i32) -> (i32, i32) {
    %c0_i32 = arith.constant 0 : i32
    %c0_i32_0 = arith.constant 0 : i32
    %c0_i32_1 = arith.constant 0 : i32
    return %c0_i32, %c0_i32_0 : i32, i32
  }
  func.func @transform_2(%arg0: i32, %arg1: i32) -> (i32, i32) {
    %c0_i32 = arith.constant 0 : i32
    %c0_i32_0 = arith.constant 0 : i32
    return %arg1, %c0_i32 : i32, i32
  }
  func.func @transform_3(%arg0: i32, %arg1: i32) -> (i32, i32) {
    %c0_i32 = arith.constant 0 : i32
    %c0_i32_0 = arith.constant 0 : i32
    %c0_i32_1 = arith.constant 0 : i32
    return %c0_i32, %c0_i32_0 : i32, i32
  }
  func.func @transform_4(%arg0: i32, %arg1: i32) -> (i32, i32) {
    %c0_i32 = arith.constant 0 : i32
    %c0_i32_0 = arith.constant 0 : i32
    %c0_i32_1 = arith.constant 0 : i32
    return %c0_i32, %c0_i32_0 : i32, i32
  }
  func.func @transform_5(%arg0: i32, %arg1: i32) -> (i32, i32, i32) {
    %c0_i32 = arith.constant 0 : i32
    %c0_i32_0 = arith.constant 0 : i32
    return %arg0, %arg1, %c0_i32 : i32, i32, i32
  }
}

</mosaic_0001>

<bundles_post_ra>
// kernel: tpu_custom_call.1
= control target key start
LH: loop header
LB: loop body
LE: loop exit
PB: predicated region body
PF: predicated region fallthrough
CT: control target
= control target key end

     0   :  { %10 = vsyncpa [#allocation3], 0  ;;  %s846_s0 = inlined_call_operand.vmem [shape: s32[2,8,1], index: 0, kind: input, shape index: {}]   ;;  %s847_s1 = inlined_call_operand.vmem [shape: bf16[32,128], index: 1, kind: input, shape index: {}]   ;;  %s848_s2 = inlined_call_operand.hbm [shape: bf16[16,128], index: 2, kind: input, shape index: {}]   ;;  %s849_s3 = inlined_call_operand.vmem [shape: f32[1,128], index: 3, kind: input, shape index: {}]   ;;  %s850_s4 = inlined_call_operand.vmem [shape: f32[1,128], index: 4, kind: input, shape index: {}]   ;;  %s851_s5 = inlined_call_operand.hbm [shape: f32[2,8,128], index: 5, kind: output, shape index: {}]  }
   0x1   :  { %11 = vsyncpa [#allocation4], 0 }
   0x2   :  { %13 = vsyncpa [#allocation4 + $0x1], 0  ;;  %s714_s18 = smov 0   ;;  %s716_s19 = smov 0  }
   0x3   :  { %s718_s20 = smov 0   ;;  %s720_s21 = smov 0  }
   0x4   :  { %s722_s22 = smov 0   ;;  %s724_s23 = smov 0  }
   0x5 LB: > { %s467_s24 = sadd.s32 4294967295, %s677_s23   ;;  %s468_s25 = sadd.s32 4294967294, %s677_s23   ;;  %s677_s23 = sphi %s724_s23, %s19_s23   ;;  %s673_s22 = sphi %s722_s22, %s860_s22   ;;  %s669_s21 = sphi %s720_s21, %s859_s21   ;;  %s665_s20 = sphi %s718_s20, %s858_s20   ;;  %s661_s19 = sphi %s716_s19, %s857_s19   ;;  %s657_s18 = sphi %s714_s18, %s856_s18  }
   0x6   : > { %s31_s26 = sadd.s32 1, %s673_s22  ;;  %s157_s27 = sadd.s32 1, %s665_s20 }
   0x7   : > { %p33_p0 = scmp.ge.s32.totalorder %s31_s26, 2  ;;  %p167_p1 = scmp.ne.s32.totalorder %s665_s20, %s661_s19 }
   0x8   : > { %p168_p2 = scmp.eq.s32.totalorder %s467_s24, 1  ;;  %p173_p3 = scmp.ne.s32.totalorder %s661_s19, %s657_s18 }
   0x9   : > { %s862_s26 = smov (%p33_p0, %s31_s26), 0  ;;  %p174_p5 = scmp.eq.s32.totalorder %s468_s25, 1 }
   0xa   : > { %p754_p4 = por %p168_p2, %p167_p1  ;;  %s152_s29 = ssub.s32 %s673_s22, %s862_s26 }
   0xb   : > { %p469_p6 = scmp.ge.s32.totalorder %s677_s23, 1  ;;  %p155_p7 = scmp.eq.s32.totalorder %s152_s29, 0 }
   0xc   : > { %p761_p8 = por %p174_p5, %p173_p3  ;;  %p181_p9 = scmp.lt.s32.totalorder %s677_s23, 3 }
   0xd   : > { %s767_s6 = scalar_select %p155_p7, %s665_s20, %s157_s27  }
   0xe   : > { %p769_p10 = pnand %p469_p6, %p181_p9  ;;  %p773_p11 = scmp.eq.s32.totalorder %s467_s24, 0 }
   0xf   : > { %s679_s9 = smov [#allocation2]  }
  0x10   : > { %p503_p12 = pneg %p769_p10  ;;  %s199_s10 = sshll.u32 %s679_s9, 4  ;;  %s200_s10 = int_to_ptr.vmem [resolvable:$true] %s199_s10 }
  0x11   : > { %s582_s11 = scalar_lea.vmem %s200_s10, 64  ;;  %p590_p5 = scmp.lt.s32.totalorder %s200_s10, %s200_s10 }
  0x12   : > { %p504_p13 = pnand %p773_p11, %p503_p12  ;;  %p583_p1 = scmp.ne.s32.totalorder %s200_s10, %s582_s11 }
  0x13   : > { %p591_p6 = scmp.lt.s32.totalorder %s582_s11, %s582_s11 }
  0x14   : > { %p573_p0 = pneg %p504_p13 }
  0x15   : > { %p592_p7 = por %p591_p6, %p590_p5 }
  0x16   : > { %p585_p2 = pnand %p583_p1, %p573_p0 }
  0x18   : > { %p586_p3 = pneg %p585_p2 }
  0x1a   : > { %p593_p9 = pnand %p592_p7, %p586_p3 }
  0x1c   : > { %596 = shalt.err (!%p593_p9)
}
  0x1d   : > { %506 = dma.hbm_to_vmem [thread:$0]  (!%p504_p13), %s848_s2, 64, %s200_s10, [#allocation3]  }
  0x1e   : > { %228 = sbr.rel (%p769_p10) target bundleno = 685 (0x2ad), region = 40 }
  0x23   : > { %648 = dma.done.wait (%p773_p11), [#allocation3], 64  }
  0x24   : > { %650 = vsyncadd (%p773_p11), [#allocation3], 4294967232  ;;  %p258_p12 = scmp.lt.s32.totalorder %s669_s21, 1  ;;  %v680_v0 = vmov 0   ;;  %v681_v1 = vmov 0.0   ;;  %vm682_vm0 = vmmov 0   ;;  %v267_v5 = vlaneseq }
  0x25   : > { %566 = vset.pattern.permute.xlu0 %v680_v0  ;;  %489 = vmatprep.subr.bf16.mxu0 %v681_v1  ;;  %v567_v3 = vld [vmem:[%s847_s1 + $0x8] sm:$0xff]   ;;  %v568_v4 = vld [vmem:[%s847_s1] sm:$0xff]   ;;  %vm294_vm2 = vcmask 261120   ;;  %s255_s8 = sand.u32 1, %s661_s19   ;;  %s683_s7 = smov [#allocation5]  }
  0x26   : > { %s259_s14 = scalar_select %p258_p12, %s669_s21, 1  ;;  %493 = vmatprep.mubr.msk.bf16.mxu0 %vm682_vm0, %v681_v1  ;;  %490 = vmatpush3.bf16.msra.mxu0 %v567_v3  ;;  %v268_v6 = vand.u32 127, %v267_v5  ;;  %v280_v10 = vld [vmem:[#allocation2] sm:$0xf] }
  0x27   : > { %491 = vmatprep.subr.bf16.mxu0 %v681_v1  ;;  %v281_v11 = vunpack.c.l.bf16 %v280_v10  ;;  %s474_s9 = sshll.u32 %s255_s8, 3  ;;  %v480_v25 = vld [vmem:[%s849_s3] ss:$0 sm:$0xff]  ;;  %s368_s27 = scalar_lea.sflag [#allocation4], %s255_s8 }
  0x28   : > { %s475_s15 = sshll.u32 %s259_s14, 3  ;;  %v481_v27 = vld [vmem:[%s850_s4] ss:$0 sm:$0xff]  ;;  %s483_s14 = sshll.u32 %s669_s21, 7 }
  0x29   : > { %s264_s24 = scalar_lea.vmem %s846_s0, %s475_s15  ;;  %s257_s15 = scalar_lea.vmem [#allocation5], %s474_s9 }
  0x2a   : > { %v266_v2 = vld [vmem:[%s264_s24] sm:$0xff]  ;;  %492 = vmatpush3.bf16.msra.mxu0 %v568_v4  ;;  %s382_s16 = sshll.u32 %s257_s15, 4  ;;  %s380_s25 = scalar_lea.hbm %s851_s5, %s483_s14  ;;  %s383_s16 = int_to_ptr.vmem [resolvable:$true] %s382_s16 }
  0x2b   : > { %270 = vperm.xlu0 %566, %v266_v2   ;;  %s597_s29 = scalar_lea.vmem %s383_s16, 128  ;;  %s601_s10 = sshll.u32 %s683_s7, 4  ;;  %s602_s10 = int_to_ptr.vmem [resolvable:$false] %s601_s10 }
  0x2c   : > { %p598_p10 = scmp.ne.s32.totalorder %s383_s16, %s597_s29  ;;  %s603_s21 = scalar_lea.vmem %s602_s10, 256 }
  0x2d   : > { %p604_p0 = scmp.lt.s32.totalorder %s383_s16, %s602_s10  ;;  %p605_p1 = scmp.lt.s32.totalorder %s603_s21, %s597_s29 }
  0x2e   : > { %p599_p11 = pnand %p598_p10, %p754_p4 }
  0x2f   : > { %p606_p2 = por %p605_p1, %p604_p0 }
  0x30   : > { %p600_p13 = pneg %p599_p11 }
  0x32   : > { %p607_p3 = pnand %p606_p2, %p600_p13 }
  0xa6   : > { %v271_v7 = vpop.permute.xlu0 %270 }
  0xa7   : > { %vm272_vm1 = vcmp.eq.s32.totalorder %v271_v7, %v268_v6 }
  0xa8   : > { %v476_v8 = vsel %vm272_vm1, 1.0, %v681_v1 }
  0xa9   : > { %v275_v9 = vpack.c.bf16 %v476_v8, %v476_v8 }
  0xab   : > { %494 = vmatmul.mubr.msk.bf16.vlgmr.msra.gmra.mxu0 %vm294_vm2, %v275_v9 }
 0x16b   : > { %v332_v12 = vpop.f32.mrf.mxu0 }
 0x16c   : > { %v333_v13 = vadd.f32 %v332_v12, %v281_v11 }
 0x16d   : > { %v495_v14 = vpop.f32.mrf.mxu0 }
 0x16e   : > { %338 = vadd.xlane.f32.xlu0 %v333_v13 }
 0x16f   : > { %v335_v15 = vpop.f32.mrf.mxu0 }
 0x171   : > { %v496_v16 = vpop.f32.mrf.mxu0 }
 0x1f7   : > { %v339_v17 = vpop.xlane.xlu0 %338 }
 0x1f8   : > { %v341_v18 = vmul.f32 0.0078125, %v339_v17 }
 0x1fa   : > { %v342_v19 = vsub.f32 %v333_v13, %v341_v18 }
 0x1fc   : > { %v343_v20 = vmul.f32 %v342_v19, %v342_v19 }
 0x1fe   : > { %344 = vadd.xlane.f32.xlu1 %v343_v20 }
 0x287   : > { %v345_v21 = vpop.xlane.xlu1 %344 }
 0x288   : > { %v346_v22 = vmul.f32 0.0078125, %v345_v21 }
 0x28a   : > { %v347_v23 = vadd.f32 1e-05, %v346_v22 }
 0x28c   : > { %569 = vrsqrt.f32 %v347_v23 }
 0x299   : > { %v570_v24 = vpop.eup %569 }
 0x29a   : > { %v349_v26 = vmul.f32 %v570_v24, %v342_v19 }
 0x29c   : > { %v357_v28 = vmul.f32 %v480_v25, %v349_v26 }
 0x29e   : > { %v365_v29 = vadd.f32 %v481_v27, %v357_v28 }
 0x2a0   : > { %366 = vst [vmem:[%s257_s15] sm:$0xff] %v365_v29 }
 0x2a1   : > { %610 = shalt.err (!%p607_p3)
}
 0x2a2   : > { %s611_s9 = scalar_lea.hbm %s380_s25, 128  ;;  %s615_s12 = scalar_lea.hbm %s851_s5, 256 }
 0x2a3   : > { %p612_p5 = scmp.ne.s32.totalorder %s380_s25, %s611_s9  ;;  %p616_p9 = scmp.lt.s32.totalorder %s380_s25, %s851_s5 }
 0x2a4   : > { %p617_p12 = scmp.lt.s32.totalorder %s615_s12, %s611_s9 }
 0x2a5   : > { %p613_p6 = pnand %p612_p5, %p754_p4 }
 0x2a6   : > { %p618_p10 = por %p617_p12, %p616_p9 }
 0x2a7   : > { %p614_p7 = pneg %p613_p6 }
 0x2a9   : > { %p619_p11 = pnand %p618_p10, %p614_p7 }
 0x2ab   : > { %622 = shalt.err (!%p619_p11)
}
 0x2ac   : > { %501 = dma.vmem_to_hbm [thread:$0]  (%p754_p4), %s383_s16, 128, %s380_s25, %s368_s27  }
 0x2ad PF: > { %p513_p13 = scmp.ge.s32.totalorder %s677_s23, 2  ;;  %s394_s15 = sand.u32 1, %s657_s18  }
 0x2ae   : > { %s395_s17 = scalar_lea.sflag [#allocation4], %s394_s15 }
 0x2af   : > { %p508_p0 = pnand %p513_p13, %p761_p8 }
 0x2b1   : > { %p509_p1 = pneg %p508_p0 }
 0x2b3   : > { %652 = dma.done.wait (%p509_p1), %s395_s17, 128  }
 0x2b4   : > { %654 = vsyncadd (%p509_p1), %s395_s17, 4294967168  ;;  %s19_s23 = sadd.s32 1, %s677_s23   ;;  %s856_s18 = smov %s661_s19 }
 0x2b5   : > { %p16_p2 = scmp.ge.s32.totalorder %s19_s23, 4   ;;  %s857_s19 = smov %s665_s20 }
 0x2b6   : > { %s858_s20 = smov %s767_s6  ;;  %s859_s21 = smov %s673_s22 }
 0x2b7   : > { %s860_s22 = smov %s862_s26  ;;  %18 = sbr.rel (!%p16_p2) target bundleno = 5 (0x5), region = 81 }
 0x2bc   :  { %400 = vsyncpa [#allocation3], 1 }
 0x2bd   :  { %402 = vsyncpa [#allocation3 + $0x1], 1 }
 0x2be   :  { %403 = vsyncpa [#allocation4], 1 }
 0x2bf   :  { %405 = vsyncpa [#allocation4 + $0x1], 1 }

</bundles_post_ra>
